<compile_context>
chip_gen: v7x
topology: tpu7x:2x2x1
jax: 0.10.0
libtpu: 0.0.40
codegen_flags: <defaults>
</compile_context>

<pallas_src>
import functools

import jax
import jax.numpy as jnp
from jax import lax
from jax.experimental import pallas as pl
from jax.experimental.pallas import tpu as pltpu


def _round_up(v, m):
    return ((v + m - 1) // m) * m


def _vmem_capacity_bytes():
    try:
        return int(pltpu.get_tpu_info().vmem_capacity_bytes)
    except Exception:
        return 64 << 20  # conservative fallback (v7x per-core VMEM)


# --------------- fused, adjacency-resident kernel (small graphs) -------------

def _appnp2_fused_kernel(x_ref, w1_ref, b1_ref, w2_ref, b2_ref, adj_ref,
                         o_ref, *, k, alpha):
    # MLP: fc1 -> relu -> fc2.  bf16 operands on the MXU, f32 accumulation.
    h1 = jnp.maximum(
        jnp.dot(x_ref[...], w1_ref[...], preferred_element_type=jnp.float32)
        + b1_ref[...], 0.0)
    h = jnp.dot(h1.astype(jnp.bfloat16), w2_ref[...],
                preferred_element_type=jnp.float32) + b2_ref[...]

    # APPNP: z <- adj_scaled @ z + alpha*h, k times.  adj carries (1 - alpha).
    ah = alpha * h                 # hoisted: computed once, not k times
    adj = adj_ref[...]             # bf16, resident in VMEM

    def body(_, z):
        return jnp.dot(adj, z.astype(jnp.bfloat16),
                       preferred_element_type=jnp.float32) + ah

    z = lax.fori_loop(0, k, body, h, unroll=True)
    o_ref[...] = z.astype(o_ref.dtype)


# --------------- streamed path: MLP kernel + propagation kernel --------------

def _mlp_kernel(x_ref, w1_ref, b1_ref, w2_ref, b2_ref, h_ref):
    h1 = jnp.maximum(
        jnp.dot(x_ref[...], w1_ref[...], preferred_element_type=jnp.float32)
        + b1_ref[...], 0.0)
    h_ref[...] = (jnp.dot(h1.astype(jnp.bfloat16), w2_ref[...],
                          preferred_element_type=jnp.float32)
                  + b2_ref[...]).astype(h_ref.dtype)


def _prop_kernel(h_ref, adj_ref, o_ref, zbuf, *, alpha, tm):
    t = pl.program_id(0)          # propagation step
    i = pl.program_id(1)          # adjacency row block

    @pl.when((t == 0) & (i == 0))
    def _():
        zbuf[0] = h_ref[...]      # z_0 = h

    src = lax.rem(t, 2)           # read z_t
    dst = lax.rem(t + 1, 2)       # write z_{t+1}
    row0 = pl.multiple_of(i * tm, tm)

    rows = (jnp.dot(adj_ref[...], zbuf[src].astype(jnp.bfloat16),
                    preferred_element_type=jnp.float32)
            + alpha * h_ref[pl.ds(row0, tm), :])
    zbuf[dst, pl.ds(row0, tm), :] = rows
    o_ref[...] = rows.astype(o_ref.dtype)   # last step's write wins


# ------------------------------- host wrapper --------------------------------

def appnp2_forward(x, w1, b1, w2, b2, adj, *, k=5, alpha=0.1,
                   force_streamed=False):
    """x: [N, n_in], w1: [n_in, n_hid], b1: [1, n_hid], w2: [n_hid, n_out],
       b2: [1, n_out], adj: [N, N] dense gcn-normalized adjacency."""
    N, n_in = x.shape
    n_hid = w1.shape[1]
    n_out = w2.shape[1]

    # MXU / lane alignment: pad every minor-two dim to multiples of 128.
    n_p = _round_up(N, 128)
    n_in_p = _round_up(n_in, 128)
    n_hid_p = _round_up(n_hid, 128)
    n_out_p = _round_up(n_out, 128)

    # bf16 operands for the MXU matmuls (f32 accumulation inside the kernels).
    x_p = jnp.zeros((n_p, n_in_p), jnp.bfloat16).at[:N, :n_in].set(
        x.astype(jnp.bfloat16))
    w1_p = jnp.zeros((n_in_p, n_hid_p), jnp.bfloat16).at[:n_in, :n_hid].set(
        w1.astype(jnp.bfloat16))
    b1_p = jnp.zeros((1, n_hid_p), jnp.float32).at[:, :n_hid].set(b1)
    w2_p = jnp.zeros((n_hid_p, n_out_p), jnp.bfloat16).at[:n_hid, :n_out].set(
        w2.astype(jnp.bfloat16))
    b2_p = jnp.zeros((1, n_out_p), jnp.float32).at[:, :n_out].set(b2)
    # (1 - alpha) folded into the adjacency once; padded rows/cols stay zero
    # (real rows never pick up contributions from padded z rows).
    adj_p = jnp.zeros((n_p, n_p), jnp.bfloat16).at[:N, :N].set(
        ((1.0 - alpha) * adj).astype(jnp.bfloat16))

    vmem_cap = _vmem_capacity_bytes()
    headroom = 8 << 20

    def nbytes(a):
        return int(a.size) * a.dtype.itemsize

    # Resident-set estimate of the fused kernel (operands + temps + output).
    fused_bytes = (nbytes(x_p) + nbytes(w1_p) + nbytes(b1_p) + nbytes(w2_p)
                   + nbytes(b2_p) + nbytes(adj_p)
                   + n_p * n_hid_p * 4          # h1
                   + 3 * n_p * n_out_p * 4      # h, alpha*h, z
                   + n_p * n_out_p * 4)         # output
    use_fused = (not force_streamed) and (fused_bytes + headroom <= vmem_cap)

    if use_fused:
        kernel = functools.partial(_appnp2_fused_kernel, k=int(k),
                                   alpha=float(alpha))
        operands = (x_p, w1_p, b1_p, w2_p, b2_p, adj_p)

        def full(shape):
            return pl.BlockSpec(shape, lambda: (0,) * len(shape),
                                memory_space=pltpu.VMEM)

        vmem_limit = int(min(vmem_cap, max(32 << 20, fused_bytes + headroom)))
        out = pl.pallas_call(
            kernel,
            out_shape=jax.ShapeDtypeStruct((n_p, n_out_p), jnp.float32),
            in_specs=[full(a.shape) for a in operands],
            out_specs=full((n_p, n_out_p)),
            compiler_params=pltpu.CompilerParams(vmem_limit_bytes=vmem_limit),
        )(*operands)
        return out[:N, :n_out]

    # ---------------- streamed path (adjacency does not fit VMEM) ------------
    # Row-block size: largest nice divisor of n_p whose double-buffered
    # adjacency block stays well inside VMEM.
    tm = 128
    for cand in (512, 256):
        if n_p % cand == 0 and 2 * cand * n_p * 2 <= vmem_cap // 4:
            tm = cand
            break
    nb = n_p // tm

    # 1) MLP, tiled over node-row blocks (independent => megacore-parallel).
    mlp_bytes = (nbytes(w1_p) + nbytes(w2_p) + nbytes(b1_p) + nbytes(b2_p)
                 + 2 * tm * n_in_p * 2 + 2 * tm * n_out_p * 4
                 + tm * n_hid_p * 4 + tm * n_out_p * 4)
    h = pl.pallas_call(
        _mlp_kernel,
        out_shape=jax.ShapeDtypeStruct((n_p, n_out_p), jnp.float32),
        grid_spec=pltpu.PrefetchScalarGridSpec(
            num_scalar_prefetch=0,
            grid=(nb,),
            in_specs=[
                pl.BlockSpec((tm, n_in_p), lambda i: (i, 0)),
                pl.BlockSpec((n_in_p, n_hid_p), lambda i: (0, 0)),
                pl.BlockSpec((1, n_hid_p), lambda i: (0, 0)),
                pl.BlockSpec((n_hid_p, n_out_p), lambda i: (0, 0)),
                pl.BlockSpec((1, n_out_p), lambda i: (0, 0)),
            ],
            out_specs=pl.BlockSpec((tm, n_out_p), lambda i: (i, 0)),
        ),
        compiler_params=pltpu.CompilerParams(
            dimension_semantics=("parallel",),
            vmem_limit_bytes=int(min(vmem_cap,
                                     max(32 << 20, mlp_bytes + headroom)))),
    )(x_p, w1_p, b1_p, w2_p, b2_p)

    if int(k) == 0:
        return h[:N, :n_out]

    # 2) Propagation: grid (k, row blocks).  Adjacency row block streamed per
    #    step; z ping-ponged between two full VMEM scratch buffers on step
    #    parity.  Must stay sequential ("arbitrary") because of the shared
    #    z scratch across grid steps.
    # TODO(synk): for graphs where even (3 * n_p * n_out_p * 4) f32 does not
    #             fit VMEM, also tile the z columns.
    prop_bytes = (2 * n_p * n_out_p * 4          # h (double-buffered bound)
                  + 2 * n_p * n_out_p * 4        # z ping-pong scratch
                  + 2 * tm * n_p * 2             # adj block double buffer
                  + 2 * tm * n_out_p * 4)        # output block double buffer
    prop = functools.partial(_prop_kernel, alpha=float(alpha), tm=tm)
    out = pl.pallas_call(
        prop,
        out_shape=jax.ShapeDtypeStruct((n_p, n_out_p), jnp.float32),
        grid_spec=pltpu.PrefetchScalarGridSpec(
            num_scalar_prefetch=0,
            grid=(int(k), nb),
            in_specs=[
                pl.BlockSpec((n_p, n_out_p), lambda t, i: (0, 0)),   # h
                pl.BlockSpec((tm, n_p), lambda t, i: (i, 0)),        # adj rows
            ],
            out_specs=pl.BlockSpec((tm, n_out_p), lambda t, i: (i, 0)),
            scratch_shapes=[pltpu.VMEM((2, n_p, n_out_p), jnp.float32)],
        ),
        compiler_params=pltpu.CompilerParams(
            dimension_semantics=("arbitrary", "arbitrary"),
            vmem_limit_bytes=int(min(vmem_cap,
                                     max(32 << 20, prop_bytes + headroom)))),
    )(h, adj_p)
    return out[:N, :n_out]


# ------------------------------ plain-JAX glue --------------------------------

def build_normalized_adj(edge_index, num_nodes):
    """Dense GCN-normalized adjacency, matching PyG gcn_norm:
    duplicate edges accumulate, self-loops added only where missing."""
    src, dst = edge_index[0], edge_index[1]
    a = jnp.zeros((num_nodes, num_nodes), jnp.float32).at[dst, src].add(1.0)
    diag = jnp.diagonal(a)
    a = a + jnp.diag(jnp.where(diag > 0, 0.0, 1.0))   # add_remaining_self_loops
    deg = jnp.sum(a, axis=1)
    d_inv_sqrt = jnp.where(deg > 0, lax.rsqrt(deg), 0.0)
    return d_inv_sqrt[:, None] * a * d_inv_sqrt[None, :]


def xavier_uniform(key, shape, gain):
    # shape = (fan_in, fan_out) for x @ W convention (== torch weight.T)
    fan_in, fan_out = shape
    limit = gain * jnp.sqrt(6.0 / (fan_in + fan_out))
    return jax.random.uniform(key, shape, jnp.float32, -limit, limit)


if __name__ == "__main__":
    # Small deterministic problem.
    N, n_in, n_hid, n_out = 64, 32, 32, 16
    k, alpha = 5, 0.1

    root = jax.random.PRNGKey(0)
    kx, ke, kw1, kb1, kw2, kb2 = jax.random.split(root, 6)

    x = jax.random.normal(kx, (N, n_in), jnp.float32)
    num_edges = 256
    edge_index = jax.random.randint(ke, (2, num_edges), 0, N, jnp.int32)
    adj = build_normalized_adj(edge_index, N)

    # Parameters (matching the module's reset_parameters):
    #   fc1: xavier_uniform with gain('relu') = sqrt(2); fc2: gain = 1.414.
    w1 = xavier_uniform(kw1, (n_in, n_hid), gain=jnp.sqrt(2.0))
    w2 = xavier_uniform(kw2, (n_hid, n_out), gain=1.414)
    # Biases use nn.Linear's default uniform(-1/sqrt(fan_in), 1/sqrt(fan_in)).
    b1 = jax.random.uniform(kb1, (1, n_hid), jnp.float32,
                            -1.0 / jnp.sqrt(n_in), 1.0 / jnp.sqrt(n_in))
    b2 = jax.random.uniform(kb2, (1, n_out), jnp.float32,
                            -1.0 / jnp.sqrt(n_hid), 1.0 / jnp.sqrt(n_hid))

    # Run both the fused (adjacency-resident) and the streamed/tiled paths.
    out_fused = appnp2_forward(x, w1, b1, w2, b2, adj, k=k, alpha=alpha)
    out_streamed = appnp2_forward(x, w1, b1, w2, b2, adj, k=k, alpha=alpha,
                                  force_streamed=True)
    out_fused, out_streamed = jax.block_until_ready((out_fused, out_streamed))
    assert out_fused.shape == (N, n_out)
    assert out_streamed.shape == (N, n_out)

    # Reference 1: matches the kernels' numerics (bf16 MXU operands, f32 acc).
    h1 = jnp.maximum(
        jnp.dot(x.astype(jnp.bfloat16), w1.astype(jnp.bfloat16),
                preferred_element_type=jnp.float32) + b1, 0.0)
    h_q = jnp.dot(h1.astype(jnp.bfloat16), w2.astype(jnp.bfloat16),
                  preferred_element_type=jnp.float32) + b2
    adj_bf = ((1.0 - alpha) * adj).astype(jnp.bfloat16)
    z_q = h_q
    for _ in range(k):
        z_q = jnp.dot(adj_bf, z_q.astype(jnp.bfloat16),
                      preferred_element_type=jnp.float32) + alpha * h_q

    # Reference 2: exact eval-mode module semantics, all f32 (looser tolerance
    # absorbs the intentional bf16 quantization of the MXU operands).
    h_f = jnp.maximum(x @ w1 + b1, 0.0) @ w2 + b2
    z_f = h_f
    for _ in range(k):
        z_f = (1.0 - alpha) * (adj @ z_f) + alpha * h_f

    assert jnp.allclose(out_fused, out_streamed, atol=2e-2, rtol=2e-2)
    assert jnp.allclose(out_fused, z_q, atol=2e-2, rtol=2e-2)
    assert jnp.allclose(out_fused, z_f, atol=6e-2, rtol=6e-2)
    assert jnp.allclose(out_streamed, z_f, atol=6e-2, rtol=6e-2)

    print("KERNEL_OK")
</pallas_src>

<mosaic_0001>
module attributes {stable_mosaic.version = 11 : i64} {
  func.func @_appnp2_fused_kernel(%arg0: memref<128x128xbf16, #tpu.memory_space<vmem>>, %arg1: memref<128x128xbf16, #tpu.memory_space<vmem>>, %arg2: memref<1x128xf32, #tpu.memory_space<vmem>>, %arg3: memref<128x128xbf16, #tpu.memory_space<vmem>>, %arg4: memref<1x128xf32, #tpu.memory_space<vmem>>, %arg5: memref<128x128xbf16, #tpu.memory_space<vmem>>, %arg6: memref<128x128xf32, #tpu.memory_space<vmem>>) attributes {dimension_semantics = [], scalar_prefetch = 0 : i64, scratch_operands = 0 : i64, tpu.core_type = #tpu.core_type<tc>} {
    %c0 = arith.constant 0 : index
    %c0_0 = arith.constant 0 : index
    %0 = vector.load %arg0[%c0, %c0_0] : memref<128x128xbf16, #tpu.memory_space<vmem>>, vector<128x128xbf16>
    %c0_1 = arith.constant 0 : index
    %c0_2 = arith.constant 0 : index
    %1 = vector.load %arg1[%c0_1, %c0_2] : memref<128x128xbf16, #tpu.memory_space<vmem>>, vector<128x128xbf16>
    %cst = arith.constant dense<0.000000e+00> : vector<128x128xf32>
    %2 = tpu.matmul %0, %1, %cst {dimension_numbers = #tpu.dot_dimension_numbers<[1], [0], [0], [1], [0, 0, 1, 1], [], []>} : vector<128x128xbf16>, vector<128x128xbf16>, vector<128x128xf32> -> vector<128x128xf32>
    %c0_3 = arith.constant 0 : index
    %c0_4 = arith.constant 0 : index
    %3 = vector.load %arg2[%c0_3, %c0_4] : memref<1x128xf32, #tpu.memory_space<vmem>>, vector<1x128xf32>
    %4 = vector.broadcast %3 : vector<1x128xf32> to vector<128x128xf32>
    %5 = arith.addf %2, %4 : vector<128x128xf32>
    %cst_5 = arith.constant 0.000000e+00 : f32
    %6 = vector.broadcast %cst_5 : f32 to vector<128x128xf32>
    %7 = arith.maximumf %5, %6 : vector<128x128xf32>
    %8 = arith.truncf %7 : vector<128x128xf32> to vector<128x128xbf16>
    %c0_6 = arith.constant 0 : index
    %c0_7 = arith.constant 0 : index
    %9 = vector.load %arg3[%c0_6, %c0_7] : memref<128x128xbf16, #tpu.memory_space<vmem>>, vector<128x128xbf16>
    %cst_8 = arith.constant dense<0.000000e+00> : vector<128x128xf32>
    %10 = tpu.matmul %8, %9, %cst_8 {dimension_numbers = #tpu.dot_dimension_numbers<[1], [0], [0], [1], [0, 0, 1, 1], [], []>} : vector<128x128xbf16>, vector<128x128xbf16>, vector<128x128xf32> -> vector<128x128xf32>
    %c0_9 = arith.constant 0 : index
    %c0_10 = arith.constant 0 : index
    %11 = vector.load %arg4[%c0_9, %c0_10] : memref<1x128xf32, #tpu.memory_space<vmem>>, vector<1x128xf32>
    %12 = vector.broadcast %11 : vector<1x128xf32> to vector<128x128xf32>
    %13 = arith.addf %10, %12 : vector<128x128xf32>
    %cst_11 = arith.constant 1.000000e-01 : f32
    %14 = vector.broadcast %cst_11 : f32 to vector<128x128xf32>
    %15 = arith.mulf %14, %13 : vector<128x128xf32>
    %c0_12 = arith.constant 0 : index
    %c0_13 = arith.constant 0 : index
    %16 = vector.load %arg5[%c0_12, %c0_13] : memref<128x128xbf16, #tpu.memory_space<vmem>>, vector<128x128xbf16>
    %c0_i32 = arith.constant 0 : i32
    %17 = arith.truncf %13 : vector<128x128xf32> to vector<128x128xbf16>
    %cst_14 = arith.constant dense<0.000000e+00> : vector<128x128xf32>
    %18 = tpu.matmul %16, %17, %cst_14 {dimension_numbers = #tpu.dot_dimension_numbers<[1], [0], [0], [1], [0, 0, 1, 1], [], []>} : vector<128x128xbf16>, vector<128x128xbf16>, vector<128x128xf32> -> vector<128x128xf32>
    %19 = arith.addf %18, %15 : vector<128x128xf32>
    %c1_i32 = arith.constant 1 : i32
    %20 = arith.truncf %19 : vector<128x128xf32> to vector<128x128xbf16>
    %cst_15 = arith.constant dense<0.000000e+00> : vector<128x128xf32>
    %21 = tpu.matmul %16, %20, %cst_15 {dimension_numbers = #tpu.dot_dimension_numbers<[1], [0], [0], [1], [0, 0, 1, 1], [], []>} : vector<128x128xbf16>, vector<128x128xbf16>, vector<128x128xf32> -> vector<128x128xf32>
    %22 = arith.addf %21, %15 : vector<128x128xf32>
    %c2_i32 = arith.constant 2 : i32
    %23 = arith.truncf %22 : vector<128x128xf32> to vector<128x128xbf16>
    %cst_16 = arith.constant dense<0.000000e+00> : vector<128x128xf32>
    %24 = tpu.matmul %16, %23, %cst_16 {dimension_numbers = #tpu.dot_dimension_numbers<[1], [0], [0], [1], [0, 0, 1, 1], [], []>} : vector<128x128xbf16>, vector<128x128xbf16>, vector<128x128xf32> -> vector<128x128xf32>
    %25 = arith.addf %24, %15 : vector<128x128xf32>
    %c3_i32 = arith.constant 3 : i32
    %26 = arith.truncf %25 : vector<128x128xf32> to vector<128x128xbf16>
    %cst_17 = arith.constant dense<0.000000e+00> : vector<128x128xf32>
    %27 = tpu.matmul %16, %26, %cst_17 {dimension_numbers = #tpu.dot_dimension_numbers<[1], [0], [0], [1], [0, 0, 1, 1], [], []>} : vector<128x128xbf16>, vector<128x128xbf16>, vector<128x128xf32> -> vector<128x128xf32>
    %28 = arith.addf %27, %15 : vector<128x128xf32>
    %c4_i32 = arith.constant 4 : i32
    %29 = arith.truncf %28 : vector<128x128xf32> to vector<128x128xbf16>
    %cst_18 = arith.constant dense<0.000000e+00> : vector<128x128xf32>
    %30 = tpu.matmul %16, %29, %cst_18 {dimension_numbers = #tpu.dot_dimension_numbers<[1], [0], [0], [1], [0, 0, 1, 1], [], []>} : vector<128x128xbf16>, vector<128x128xbf16>, vector<128x128xf32> -> vector<128x128xf32>
    %31 = arith.addf %30, %15 : vector<128x128xf32>
    %c0_19 = arith.constant 0 : index
    %c0_20 = arith.constant 0 : index
    %32 = vector.load %arg6[%c0_19, %c0_20] : memref<128x128xf32, #tpu.memory_space<vmem>>, vector<128x128xf32>
    tpu.vector_store %arg6[%c0_19, %c0_20], %31 {strides = array<i32>} : memref<128x128xf32, #tpu.memory_space<vmem>>, vector<128x128xf32>,
    return
  }
}

</mosaic_0001>

<bundles_post_ra>
// kernel: tpu_custom_call.1
= control target key start
LH: loop header
LB: loop body
LE: loop exit
PB: predicated region body
PF: predicated region fallthrough
CT: control target
= control target key end

     0   :  { %11 = vsyncpa [#allocation3], 0  ;;  %s2057_s0 = inlined_call_operand.hbm [shape: bf16[128,128], index: 0, kind: input, shape index: {}]   ;;  %s2058_s1 = inlined_call_operand.hbm [shape: bf16[128,128], index: 1, kind: input, shape index: {}]   ;;  %s2059_s2 = inlined_call_operand.vmem [shape: f32[1,128], index: 2, kind: input, shape index: {}]   ;;  %s2060_s3 = inlined_call_operand.hbm [shape: bf16[128,128], index: 3, kind: input, shape index: {}]   ;;  %s2061_s4 = inlined_call_operand.vmem [shape: f32[1,128], index: 4, kind: input, shape index: {}]   ;;  %s2062_s5 = inlined_call_operand.hbm [shape: bf16[128,128], index: 5, kind: input, shape index: {}]   ;;  %s2063_s6 = inlined_call_operand.hbm [shape: f32[128,128], index: 6, kind: output, shape index: {}]  }
   0x1   :  { %12 = vsyncpa [#allocation6], 0 }
   0x2   :  { %13 = vsyncpa [#allocation9], 0 }
   0x3   :  { %14 = vsyncpa [#allocation4], 0  ;;  %s1689_s21 = smov [#allocation5]   ;;  %s1690_s23 = smov [#allocation2]  }
   0x4   :  { %s32_s22 = sshll.u32 %s1689_s21, 4  ;;  %s20_s24 = sshll.u32 %s1690_s23, 4  ;;  %s33_s22 = int_to_ptr.vmem [resolvable:$true] %s32_s22  ;;  %s1733_s24 = int_to_ptr.vmem [resolvable:$true] %s20_s24 }
   0x5   :  { %s1571_s27 = scalar_lea.hbm %s2058_s1, 1024 }
   0x6   :  { %p1572_p0 = scmp.ne.s32.totalorder %s2058_s1, %s1571_s27  ;;  %p1575_p1 = scmp.lt.u32.totalorder %s1571_s27, %s2058_s1 }
   0x8   :  { %p1577_p2 = pnand %p1575_p1, %p1572_p0 }
   0xa   :  { %1580 = shalt.err (!%p1577_p2)
}
   0xb   :  { %s1581_s8 = scalar_lea.vmem %s33_s22, 1024  ;;  %p1586_p4 = scmp.lt.s32.totalorder %s33_s22, %s33_s22 }
   0xc   :  { %p1582_p3 = scmp.ne.s32.totalorder %s33_s22, %s1581_s8  ;;  %p1587_p5 = scmp.lt.s32.totalorder %s1581_s8, %s1581_s8 }
   0xe   :  { %p1588_p6 = por %p1587_p5, %p1586_p4 }
  0x10   :  { %p1589_p7 = pnand %p1588_p6, %p1582_p3 }
  0x12   :  { %1592 = shalt.err (!%p1589_p7)
}
  0x13   :  { %s1691_s9 = smov 64   ;;  %s1692_s10 = smov 4  }
  0x14   :  { %38 = dma.hbm_to_vmem [thread:$0]  %s2058_s1, 1024, %s33_s22, [#allocation6], %s1691_s9, %s1691_s9, %s1692_s10  }
  0x15   :  { %s1593_s15 = scalar_lea.hbm %s2057_s0, 1024 }
  0x16   :  { %p1594_p8 = scmp.ne.s32.totalorder %s2057_s0, %s1593_s15  ;;  %p1597_p9 = scmp.lt.u32.totalorder %s1593_s15, %s2057_s0 }
  0x18   :  { %p1599_p10 = pnand %p1597_p9, %p1594_p8 }
  0x1a   :  { %1602 = shalt.err (!%p1599_p10)
}
  0x1b   :  { %s1603_s20 = scalar_lea.vmem %s1733_s24, 1024  ;;  %p1608_p12 = scmp.lt.s32.totalorder %s1733_s24, %s1733_s24 }
  0x1c   :  { %p1604_p11 = scmp.ne.s32.totalorder %s1733_s24, %s1603_s20  ;;  %p1609_p13 = scmp.lt.s32.totalorder %s1603_s20, %s1603_s20 }
  0x1e   :  { %p1610_p0 = por %p1609_p13, %p1608_p12 }
  0x20   :  { %p1611_p1 = pnand %p1610_p0, %p1604_p11 }
  0x22   :  { %1614 = shalt.err (!%p1611_p1)
}
  0x23   :  { %26 = dma.hbm_to_vmem [thread:$0]  %s2057_s0, 1024, %s1733_s24, [#allocation3], %s1691_s9, %s1691_s9, %s1692_s10  }
  0x24   :  { %s1693_s22 = smov [#allocation7]   ;;  %s1694_s25 = smov [#allocation8]  }
  0x25   :  { %s46_s23 = sshll.u32 %s1693_s22, 4  ;;  %s60_s26 = sshll.u32 %s1694_s25, 4  ;;  %s47_s23 = int_to_ptr.vmem [resolvable:$true] %s46_s23  ;;  %s1770_s26 = int_to_ptr.vmem [resolvable:$true] %s60_s26 }
  0x26   :  { %s1615_s29 = scalar_lea.hbm %s2060_s3, 1024 }
  0x27   :  { %p1616_p2 = scmp.ne.s32.totalorder %s2060_s3, %s1615_s29  ;;  %p1619_p3 = scmp.lt.u32.totalorder %s1615_s29, %s2060_s3 }
  0x29   :  { %p1621_p4 = pnand %p1619_p3, %p1616_p2 }
  0x2b   :  { %1624 = shalt.err (!%p1621_p4)
}
  0x2c   :  { %s1625_s0 = scalar_lea.vmem %s47_s23, 1024  ;;  %p1630_p6 = scmp.lt.s32.totalorder %s47_s23, %s47_s23 }
  0x2d   :  { %p1626_p5 = scmp.ne.s32.totalorder %s47_s23, %s1625_s0  ;;  %p1631_p7 = scmp.lt.s32.totalorder %s1625_s0, %s1625_s0 }
  0x2f   :  { %p1632_p8 = por %p1631_p7, %p1630_p6 }
  0x31   :  { %p1633_p9 = pnand %p1632_p8, %p1626_p5 }
  0x33   :  { %1636 = shalt.err (!%p1633_p9)
}
  0x34   :  { %52 = dma.hbm_to_vmem [thread:$0]  %s2060_s3, 1024, %s47_s23, [#allocation6], %s1691_s9, %s1691_s9, %s1692_s10  }
  0x35   :  { %s1637_s15 = scalar_lea.hbm %s2062_s5, 1024 }
  0x36   :  { %p1638_p10 = scmp.ne.s32.totalorder %s2062_s5, %s1637_s15  ;;  %p1641_p11 = scmp.lt.u32.totalorder %s1637_s15, %s2062_s5 }
  0x38   :  { %p1643_p12 = pnand %p1641_p11, %p1638_p10 }
  0x3a   :  { %1646 = shalt.err (!%p1643_p12)
}
  0x3b   :  { %s1647_s20 = scalar_lea.vmem %s1770_s26, 1024  ;;  %p1652_p0 = scmp.lt.s32.totalorder %s1770_s26, %s1770_s26 }
  0x3c   :  { %p1648_p13 = scmp.ne.s32.totalorder %s1770_s26, %s1647_s20  ;;  %p1653_p1 = scmp.lt.s32.totalorder %s1647_s20, %s1647_s20 }
  0x3e   :  { %p1654_p2 = por %p1653_p1, %p1652_p0 }
  0x40   :  { %p1655_p3 = pnand %p1654_p2, %p1648_p13 }
  0x42   :  { %1658 = shalt.err (!%p1655_p3)
}
  0x43   :  { %66 = dma.hbm_to_vmem [thread:$0]  %s2062_s5, 1024, %s1770_s26, [#allocation9], %s1691_s9, %s1691_s9, %s1692_s10  }
  0x44   :  { %1681 = dma.done.wait [#allocation3], 1024  }
  0x45   :  { %1682 = vsyncadd [#allocation3], 4294966272 }
  0x46   :  { %1683 = dma.done.wait [#allocation6], 2048  }
  0x47   :  { %1684 = vsyncadd [#allocation6], 4294965248 }
  0x48   :  { %1685 = dma.done.wait [#allocation9], 1024  }
  0x49   :  { %1686 = vsyncadd [#allocation9], 4294966272  ;;  %v1539_v0 = vld [vmem:[#allocation5] sm:$0xff]   ;;  %v1540_v1 = vld [vmem:[#allocation5 + $0x8] sm:$0xff]  }
  0x4a   :  { %1290 = vmatprep.subr.bf16.mxu0 %v1539_v0  ;;  %v1541_v2 = vld [vmem:[#allocation5 + $0x10] sm:$0xff]   ;;  %v1542_v3 = vld [vmem:[#allocation5 + $0x18] sm:$0xff]   ;;  %v1547_v4 = vld [vmem:[#allocation2] sm:$0xff]  }
  0x4b   :  { %1291 = vmatpush3.bf16.msra.mxu0 %v1539_v0  ;;  %1306 = vmatprep.mubr.bf16.mxu0 %v1547_v4  ;;  %v1543_v5 = vld [vmem:[#allocation5 + $0x20] sm:$0xff]   ;;  %v1544_v6 = vld [vmem:[#allocation5 + $0x28] sm:$0xff]   ;;  %v1545_v9 = vld [vmem:[#allocation5 + $0x30] sm:$0xff]  }
  0x4c   :  { %1292 = vmatprep.subr.bf16.mxu0 %v1540_v1  ;;  %v1555_v7 = vld [vmem:[#allocation7] sm:$0xff]   ;;  %v1556_v8 = vld [vmem:[#allocation7 + $0x8] sm:$0xff]   ;;  %v1557_v10 = vld [vmem:[#allocation7 + $0x10] sm:$0xff]  }
  0x4d   :  { %1322 = vmatprep.subr.bf16.mxu1 %v1555_v7  ;;  %v1546_v11 = vld [vmem:[#allocation5 + $0x38] sm:$0xff]   ;;  %v1559_v13 = vld [vmem:[#allocation7 + $0x20] sm:$0xff]   ;;  %v1548_v14 = vld [vmem:[#allocation2 + $0x8] sm:$0xff]  }
  0x4e   :  { %1323 = vmatpush3.bf16.msra.mxu1 %v1555_v7  ;;  %v1558_v12 = vld [vmem:[#allocation7 + $0x18] sm:$0xff]   ;;  %v1549_v15 = vld [vmem:[#allocation2 + $0x10] sm:$0xff]   ;;  %v1560_v16 = vld [vmem:[#allocation7 + $0x28] sm:$0xff]  }
  0x4f   :  { %1293 = vmatpush3.bf16.msra.mxu0 %v1540_v1  ;;  %1324 = vmatprep.subr.bf16.mxu1 %v1556_v8  ;;  %v1550_v17 = vld [vmem:[#allocation2 + $0x18] sm:$0xff]   ;;  %v1551_v18 = vld [vmem:[#allocation2 + $0x20] sm:$0xff]   ;;  %v1552_v19 = vld [vmem:[#allocation2 + $0x28] sm:$0xff]  }
  0x50   :  { %1294 = vmatprep.subr.bf16.mxu0 %v1541_v2  ;;  %v1553_v20 = vld [vmem:[#allocation2 + $0x30] sm:$0xff]   ;;  %v1554_v21 = vld [vmem:[#allocation2 + $0x38] sm:$0xff]   ;;  %v1144_v24 = vld [vmem:[%s2059_s2] ss:$0 sm:$0xff] }
  0x51   :  { %v1561_v22 = vld [vmem:[#allocation7 + $0x30] sm:$0xff]   ;;  %v1562_v23 = vld [vmem:[#allocation7 + $0x38] sm:$0xff]  }
  0x52   :  { %1325 = vmatpush3.bf16.msra.mxu1 %v1556_v8 }
  0x53   :  { %1295 = vmatpush3.bf16.msra.mxu0 %v1541_v2  ;;  %1326 = vmatprep.subr.bf16.mxu1 %v1557_v10 }
  0x54   :  { %1296 = vmatprep.subr.bf16.mxu0 %v1542_v3 }
  0x56   :  { %1327 = vmatpush3.bf16.msra.mxu1 %v1557_v10 }
  0x57   :  { %1297 = vmatpush3.bf16.msra.mxu0 %v1542_v3  ;;  %1328 = vmatprep.subr.bf16.mxu1 %v1558_v12 }
  0x58   :  { %1298 = vmatprep.subr.bf16.mxu0 %v1543_v5 }
  0x5a   :  { %1329 = vmatpush3.bf16.msra.mxu1 %v1558_v12 }
  0x5b   :  { %1299 = vmatpush3.bf16.msra.mxu0 %v1543_v5  ;;  %1330 = vmatprep.subr.bf16.mxu1 %v1559_v13 }
  0x5c   :  { %1300 = vmatprep.subr.bf16.mxu0 %v1544_v6 }
  0x5e   :  { %1331 = vmatpush3.bf16.msra.mxu1 %v1559_v13 }
  0x5f   :  { %1301 = vmatpush3.bf16.msra.mxu0 %v1544_v6  ;;  %1332 = vmatprep.subr.bf16.mxu1 %v1560_v16 }
  0x60   :  { %1302 = vmatprep.subr.bf16.mxu0 %v1545_v9 }
  0x62   :  { %1333 = vmatpush3.bf16.msra.mxu1 %v1560_v16 }
  0x63   :  { %1303 = vmatpush3.bf16.msra.mxu0 %v1545_v9  ;;  %1334 = vmatprep.subr.bf16.mxu1 %v1561_v22 }
  0x64   :  { %1304 = vmatprep.subr.bf16.mxu0 %v1546_v11 }
  0x66   :  { %1335 = vmatpush3.bf16.msra.mxu1 %v1561_v22 }
  0x67   :  { %1305 = vmatpush3.bf16.msra.mxu0 %v1546_v11  ;;  %1336 = vmatprep.subr.bf16.mxu1 %v1562_v23 }
  0x6a   :  { %1307 = vmatmul.mubr.bf16.vlgmr.msra.gmra.mrb[0].mxu0 %v1548_v14  ;;  %1337 = vmatpush3.bf16.msra.mxu1 %v1562_v23 }
  0x6b   :  { %1310 = vmatprep.mubr.bf16.mxu0 %v1549_v15 }
  0x72   :  { %1311 = vmatmul.mubr.bf16.gmra.mrb[4].mxu0 %v1550_v17  ;;  %v1810_v17 = vld [vmem:[#allocation8] sm:$0xff]  }
  0x73   :  { %1314 = vmatprep.mubr.bf16.mxu0 %v1551_v18 }
  0x7a   :  { %1315 = vmatmul.mubr.bf16.gmra.mrb[8].mxu0 %v1552_v19  ;;  %v1161_v19 = vld [vmem:[%s2061_s4] ss:$0 sm:$0xff]  ;;  %s1695_s4 = smov [#allocation10]  }
  0x7b   :  { %1318 = vmatprep.mubr.bf16.mxu0 %v1553_v20  ;;  %s1130_s21 = sshll.u32 %s1695_s4, 4  ;;  %s1131_s21 = int_to_ptr.vmem [resolvable:$true] %s1130_s21 }
  0x7c   :  { %s1659_s22 = scalar_lea.vmem %s1131_s21, 2048  ;;  %p1664_p5 = scmp.lt.s32.totalorder %s1131_s21, %s1131_s21 }
  0x7d   :  { %p1660_p4 = scmp.ne.s32.totalorder %s1131_s21, %s1659_s22  ;;  %p1665_p6 = scmp.lt.s32.totalorder %s1659_s22, %s1659_s22 }
  0x7f   :  { %p1666_p7 = por %p1665_p6, %p1664_p5 }
  0x81   :  { %p1667_p8 = pnand %p1666_p7, %p1660_p4 }
  0x82   :  { %1319 = vmatmul.mubr.bf16.gmra.mrb[12].mxu0 %v1554_v21 }
  0x83   :  { %1370 = vmatprep.mubr.bf16.mxu0 %v1810_v17 }
 0x13d   :  { %v1308_v25 = vpop.f32.mrb[0].mxu0 }
 0x13e   :  { %v258_v26 = vadd.f32 %v1308_v25, %v1144_v24  ;;  %v249_v27 = vpop.f32.mrb[1].mxu0 }
 0x13f   :  { %v250_v28 = vadd.f32 %v1144_v24, %v249_v27  ;;  %v1309_v29 = vpop.f32.mrb[2].mxu0 }
 0x140   :  { %v261_v30 = vadd.f32 %v1309_v29, %v1144_v24  ;;  %v252_v31 = vpop.f32.mrb[3].mxu0  ;;  %v314_v33 = vmax.f32 %v258_v26, 0.0 }
 0x141   :  { %v253_v32 = vadd.f32 %v1144_v24, %v252_v31  ;;  %v312_v35 = vmax.f32 %v250_v28, 0.0 }
 0x142   :  { %v315_v34 = vmax.f32 %v261_v30, 0.0 }
 0x143   :  { %v313_v36 = vmax.f32 %v253_v32, 0.0 }
 0x144   :  { %v329_v37 = vpack.c.bf16 %v315_v34, %v314_v33 }
 0x145   :  { %v1312_v38 = vpop.f32.mrb[4].mxu0  ;;  %v328_v39 = vpack.c.bf16 %v313_v36, %v312_v35 }
 0x146   :  { %v274_v40 = vadd.f32 %v1312_v38, %v1144_v24  ;;  %v265_v41 = vpop.f32.mrb[5].mxu0 }
 0x147   :  { %v266_v42 = vadd.f32 %v1144_v24, %v265_v41  ;;  %v1313_v43 = vpop.f32.mrb[6].mxu0  ;;  %1338 = vmatprep.mubr.bf16.mxu1 %v328_v39 }
 0x148   :  { %v277_v44 = vadd.f32 %v1313_v43, %v1144_v24  ;;  %v268_v45 = vpop.f32.mrb[7].mxu0  ;;  %1339 = vmatmul.mubr.bf16.vlgmr.msra.gmra.mrb[0].mxu1 %v329_v37  ;;  %v318_v47 = vmax.f32 %v274_v40, 0.0 }
 0x149   :  { %v269_v46 = vadd.f32 %v1144_v24, %v268_v45  ;;  %v316_v49 = vmax.f32 %v266_v42, 0.0 }
 0x14a   :  { %v319_v48 = vmax.f32 %v277_v44, 0.0 }
 0x14b   :  { %v317_v50 = vmax.f32 %v269_v46, 0.0 }
 0x14c   :  { %v331_v51 = vpack.c.bf16 %v319_v48, %v318_v47 }
 0x14d   :  { %v330_v52 = vpack.c.bf16 %v317_v50, %v316_v49  ;;  %v1316_v53 = vpop.f32.mrb[8].mxu0 }
 0x14e   :  { %v290_v54 = vadd.f32 %v1316_v53, %v1144_v24  ;;  %v281_v55 = vpop.f32.mrb[9].mxu0 }
 0x14f   :  { %v282_v56 = vadd.f32 %v1144_v24, %v281_v55  ;;  %v1317_v57 = vpop.f32.mrb[10].mxu0  ;;  %1342 = vmatprep.mubr.bf16.mxu1 %v330_v52 }
 0x150   :  { %v293_v58 = vadd.f32 %v1317_v57, %v1144_v24  ;;  %v284_v59 = vpop.f32.mrb[11].mxu0  ;;  %1343 = vmatmul.mubr.bf16.gmra.mrb[4].mxu1 %v331_v51  ;;  %v322_v61 = vmax.f32 %v290_v54, 0.0 }
 0x151   :  { %v285_v60 = vadd.f32 %v1144_v24, %v284_v59  ;;  %v320_v63 = vmax.f32 %v282_v56, 0.0  ;;  %v1865_v59 = vld [vmem:[#allocation8 + $0x8] sm:$0xff]  }
 0x152   :  { %v323_v62 = vmax.f32 %v293_v58, 0.0 }
 0x153   :  { %v321_v0 = vmax.f32 %v285_v60, 0.0  ;;  %v1867_v60 = vld [vmem:[#allocation8 + $0x10] sm:$0xff]  }
 0x154   :  { %v333_v1 = vpack.c.bf16 %v323_v62, %v322_v61  ;;  %v1871_v61 = vld [vmem:[#allocation8 + $0x18] sm:$0xff]   ;;  %v1873_v62 = vld [vmem:[#allocation8 + $0x20] sm:$0xff]  }
 0x155   :  { %v332_v2 = vpack.c.bf16 %v321_v0, %v320_v63  ;;  %v1320_v3 = vpop.f32.mrb[12].mxu0  ;;  %v1877_v63 = vld [vmem:[#allocation8 + $0x28] sm:$0xff]   ;;  %v1879_v0 = vld [vmem:[#allocation8 + $0x30] sm:$0xff]  }
 0x156   :  { %v306_v4 = vadd.f32 %v1320_v3, %v1144_v24  ;;  %v297_v5 = vpop.f32.mrb[13].mxu0 }
 0x157   :  { %v298_v6 = vadd.f32 %v1144_v24, %v297_v5  ;;  %v1321_v7 = vpop.f32.mrb[14].mxu0  ;;  %1346 = vmatprep.mubr.bf16.mxu1 %v332_v2 }
 0x158   :  { %v309_v8 = vadd.f32 %v1321_v7, %v1144_v24  ;;  %v300_v9 = vpop.f32.mrb[15].mxu0  ;;  %1347 = vmatmul.mubr.bf16.gmra.mrb[8].mxu1 %v333_v1  ;;  %v326_v11 = vmax.f32 %v306_v4, 0.0  ;;  %v1883_v1 = vld [vmem:[#allocation8 + $0x38] sm:$0xff]  }
 0x159   :  { %v301_v10 = vadd.f32 %v1144_v24, %v300_v9  ;;  %v324_v13 = vmax.f32 %v298_v6, 0.0 }
 0x15a   :  { %v327_v12 = vmax.f32 %v309_v8, 0.0 }
 0x15b   :  { %v325_v14 = vmax.f32 %v301_v10, 0.0 }
 0x15c   :  { %v335_v15 = vpack.c.bf16 %v327_v12, %v326_v11 }
 0x15d   :  { %v334_v16 = vpack.c.bf16 %v325_v14, %v324_v13 }
 0x15f   :  { %1350 = vmatprep.mubr.bf16.mxu1 %v334_v16 }
 0x160   :  { %1351 = vmatmul.mubr.bf16.gmra.mrb[12].mxu1 %v335_v15 }
 0x161   :  { %1402 = vmatprep.mubr.bf16.mxu1 %v1810_v17 }
 0x21b   :  { %v1340_v18 = vpop.f32.mrb[0].mxu1 }
 0x21c   :  { %v441_v20 = vpop.f32.mrb[1].mxu1  ;;  %v1817_v22 = vadd.f32 %v1340_v18, %v1161_v19 }
 0x21d   :  { %v1341_v21 = vpop.f32.mrb[2].mxu1  ;;  %v1821_v25 = vadd.f32 %v1161_v19, %v441_v20 }
 0x21e   :  { %v1819_v23 = vadd.f32 %v1341_v21, %v1161_v19  ;;  %v444_v24 = vpop.f32.mrb[3].mxu1  ;;  %v1888_v3 = vmul.f32 0.1, %v1817_v22 }
 0x21f   :  { %v1823_v26 = vadd.f32 %v1161_v19, %v444_v24  ;;  %v1894_v6 = vmul.f32 0.1, %v1821_v25 }
 0x220   :  { %v537_v27 = vpack.c.bf16 %v1819_v23, %v1817_v22  ;;  %v1891_v4 = vmul.f32 0.1, %v1819_v23 }
 0x221   :  { %v536_v28 = vpack.c.bf16 %v1823_v26, %v1821_v25  ;;  %v1897_v7 = vmul.f32 0.1, %v1823_v26 }
 0x223   :  { %v1344_v29 = vpop.f32.mrb[4].mxu1  ;;  %1354 = vmatprep.subr.bf16.mxu0 %v536_v28 }
 0x224   :  { %v457_v30 = vpop.f32.mrb[5].mxu1  ;;  %1355 = vmatpush3.bf16.msra.mxu0 %v536_v28  ;;  %v1829_v32 = vadd.f32 %v1344_v29, %v1161_v19 }
 0x225   :  { %v1345_v31 = vpop.f32.mrb[6].mxu1  ;;  %1356 = vmatprep.subr.bf16.mxu0 %v537_v27  ;;  %v1833_v35 = vadd.f32 %v1161_v19, %v457_v30 }
 0x226   :  { %v1831_v33 = vadd.f32 %v1345_v31, %v1161_v19  ;;  %v460_v34 = vpop.f32.mrb[7].mxu1  ;;  %v1904_v18 = vmul.f32 0.1, %v1829_v32 }
 0x227   :  { %v1835_v36 = vadd.f32 %v1161_v19, %v460_v34  ;;  %v1910_v21 = vmul.f32 0.1, %v1833_v35 }
 0x228   :  { %v539_v37 = vpack.c.bf16 %v1831_v33, %v1829_v32  ;;  %1357 = vmatpush3.bf16.msra.mxu0 %v537_v27 }
 0x229   :  { %v538_v38 = vpack.c.bf16 %v1835_v36, %v1833_v35  ;;  %v1913_v22 = vmul.f32 0.1, %v1835_v36 }
 0x22b   :  { %v1348_v39 = vpop.f32.mrb[8].mxu1  ;;  %1358 = vmatprep.subr.bf16.mxu0 %v538_v38 }
 0x22c   :  { %v473_v40 = vpop.f32.mrb[9].mxu1  ;;  %1359 = vmatpush3.bf16.msra.mxu0 %v538_v38  ;;  %v1841_v42 = vadd.f32 %v1348_v39, %v1161_v19 }
 0x22d   :  { %v1349_v41 = vpop.f32.mrb[10].mxu1  ;;  %1360 = vmatprep.subr.bf16.mxu0 %v539_v37  ;;  %v1845_v45 = vadd.f32 %v1161_v19, %v473_v40 }
 0x22e   :  { %v1843_v43 = vadd.f32 %v1349_v41, %v1161_v19  ;;  %v476_v44 = vpop.f32.mrb[11].mxu1  ;;  %v1920_v32 = vmul.f32 0.1, %v1841_v42 }
 0x22f   :  { %v1847_v46 = vadd.f32 %v1161_v19, %v476_v44  ;;  %v1926_v35 = vmul.f32 0.1, %v1845_v45 }
 0x230   :  { %v541_v47 = vpack.c.bf16 %v1843_v43, %v1841_v42  ;;  %1361 = vmatpush3.bf16.msra.mxu0 %v539_v37 }
 0x231   :  { %v540_v48 = vpack.c.bf16 %v1847_v46, %v1845_v45  ;;  %v1929_v36 = vmul.f32 0.1, %v1847_v46 }
 0x233   :  { %v1352_v49 = vpop.f32.mrb[12].mxu1  ;;  %1362 = vmatprep.subr.bf16.mxu0 %v540_v48 }
 0x234   :  { %v489_v50 = vpop.f32.mrb[13].mxu1  ;;  %1363 = vmatpush3.bf16.msra.mxu0 %v540_v48  ;;  %v1853_v52 = vadd.f32 %v1352_v49, %v1161_v19 }
 0x235   :  { %v1353_v51 = vpop.f32.mrb[14].mxu1  ;;  %1364 = vmatprep.subr.bf16.mxu0 %v541_v47  ;;  %v1857_v55 = vadd.f32 %v1161_v19, %v489_v50 }
 0x236   :  { %v1855_v53 = vadd.f32 %v1353_v51, %v1161_v19  ;;  %v492_v54 = vpop.f32.mrb[15].mxu1  ;;  %v1936_v45 = vmul.f32 0.1, %v1853_v52 }
 0x237   :  { %v1859_v56 = vadd.f32 %v1161_v19, %v492_v54  ;;  %v1907_v19 = vmul.f32 0.1, %v1831_v33  ;;  %v1923_v33 = vmul.f32 0.1, %v1843_v43  ;;  %v1942_v49 = vmul.f32 0.1, %v1857_v55 }
 0x238   :  { %v543_v57 = vpack.c.bf16 %v1855_v53, %v1853_v52  ;;  %1365 = vmatpush3.bf16.msra.mxu0 %v541_v47  ;;  %v1939_v46 = vmul.f32 0.1, %v1855_v53 }
 0x239   :  { %v542_v58 = vpack.c.bf16 %v1859_v56, %v1857_v55  ;;  %v1945_v50 = vmul.f32 0.1, %v1859_v56 }
 0x23b   :  { %1366 = vmatprep.subr.bf16.mxu0 %v542_v58 }
 0x23c   :  { %1367 = vmatpush3.bf16.msra.mxu0 %v542_v58 }
 0x23d   :  { %1368 = vmatprep.subr.bf16.mxu0 %v543_v57 }
 0x240   :  { %1369 = vmatpush3.bf16.msra.mxu0 %v543_v57 }
 0x243   :  { %1371 = vmatmul.mubr.bf16.vlgmr.msra.gmra.mrb[16].mxu0 %v1865_v59 }
 0x244   :  { %1374 = vmatprep.mubr.bf16.mxu0 %v1867_v60 }
 0x24b   :  { %1375 = vmatmul.mubr.bf16.gmra.mrb[20].mxu0 %v1871_v61 }
 0x24c   :  { %1378 = vmatprep.mubr.bf16.mxu0 %v1873_v62 }
 0x253   :  { %1379 = vmatmul.mubr.bf16.gmra.mrb[24].mxu0 %v1877_v63 }
 0x254   :  { %1382 = vmatprep.mubr.bf16.mxu0 %v1879_v0 }
 0x25b   :  { %1383 = vmatmul.mubr.bf16.gmra.mrb[28].mxu0 %v1883_v1 }
 0x25c   :  { %1434 = vmatprep.mubr.bf16.mxu0 %v1810_v17 }
 0x316   :  { %v1372_v2 = vpop.f32.mrb[16].mxu0 }
 0x317   :  { %v626_v5 = vpop.f32.mrb[17].mxu0  ;;  %v635_v9 = vadd.f32 %v1372_v2, %v1888_v3 }
 0x318   :  { %v1373_v8 = vpop.f32.mrb[18].mxu0  ;;  %v627_v12 = vadd.f32 %v626_v5, %v1894_v6 }
 0x319   :  { %v638_v10 = vadd.f32 %v1373_v8, %v1891_v4  ;;  %v629_v11 = vpop.f32.mrb[19].mxu0 }
 0x31a   :  { %v630_v13 = vadd.f32 %v629_v11, %v1897_v7 }
 0x31b   :  { %v690_v14 = vpack.c.bf16 %v638_v10, %v635_v9 }
 0x31c   :  { %v689_v15 = vpack.c.bf16 %v630_v13, %v627_v12 }
 0x31e   :  { %v1376_v16 = vpop.f32.mrb[20].mxu0  ;;  %1386 = vmatprep.subr.bf16.mxu1 %v689_v15 }
 0x31f   :  { %v642_v20 = vpop.f32.mrb[21].mxu0  ;;  %1387 = vmatpush3.bf16.msra.mxu1 %v689_v15  ;;  %v651_v24 = vadd.f32 %v1376_v16, %v1904_v18 }
 0x320   :  { %v1377_v23 = vpop.f32.mrb[22].mxu0  ;;  %1388 = vmatprep.subr.bf16.mxu1 %v690_v14  ;;  %v643_v27 = vadd.f32 %v642_v20, %v1910_v21 }
 0x321   :  { %v654_v25 = vadd.f32 %v1377_v23, %v1907_v19  ;;  %v645_v26 = vpop.f32.mrb[23].mxu0 }
 0x322   :  { %v646_v28 = vadd.f32 %v645_v26, %v1913_v22 }
 0x323   :  { %v692_v29 = vpack.c.bf16 %v654_v25, %v651_v24  ;;  %1389 = vmatpush3.bf16.msra.mxu1 %v690_v14 }
 0x324   :  { %v691_v30 = vpack.c.bf16 %v646_v28, %v643_v27 }
 0x326   :  { %v1380_v31 = vpop.f32.mrb[24].mxu0  ;;  %1390 = vmatprep.subr.bf16.mxu1 %v691_v30 }
 0x327   :  { %v658_v34 = vpop.f32.mrb[25].mxu0  ;;  %1391 = vmatpush3.bf16.msra.mxu1 %v691_v30  ;;  %v667_v38 = vadd.f32 %v1380_v31, %v1920_v32 }
 0x328   :  { %v1381_v37 = vpop.f32.mrb[26].mxu0  ;;  %1392 = vmatprep.subr.bf16.mxu1 %v692_v29  ;;  %v659_v41 = vadd.f32 %v658_v34, %v1926_v35 }
 0x329   :  { %v670_v39 = vadd.f32 %v1381_v37, %v1923_v33  ;;  %v661_v40 = vpop.f32.mrb[27].mxu0 }
 0x32a   :  { %v662_v42 = vadd.f32 %v661_v40, %v1929_v36 }
 0x32b   :  { %v694_v43 = vpack.c.bf16 %v670_v39, %v667_v38  ;;  %1393 = vmatpush3.bf16.msra.mxu1 %v692_v29 }
 0x32c   :  { %v693_v44 = vpack.c.bf16 %v662_v42, %v659_v41 }
 0x32e   :  { %v1384_v47 = vpop.f32.mrb[28].mxu0  ;;  %1394 = vmatprep.subr.bf16.mxu1 %v693_v44 }
 0x32f   :  { %v674_v48 = vpop.f32.mrb[29].mxu0  ;;  %1395 = vmatpush3.bf16.msra.mxu1 %v693_v44  ;;  %v683_v54 = vadd.f32 %v1384_v47, %v1936_v45 }
 0x330   :  { %v1385_v51 = vpop.f32.mrb[30].mxu0  ;;  %1396 = vmatprep.subr.bf16.mxu1 %v694_v43  ;;  %v675_v52 = vadd.f32 %v674_v48, %v1942_v49 }
 0x331   :  { %v686_v57 = vadd.f32 %v1385_v51, %v1939_v46  ;;  %v677_v58 = vpop.f32.mrb[31].mxu0 }
 0x332   :  { %v678_v53 = vadd.f32 %v677_v58, %v1945_v50 }
 0x333   :  { %v696_v2 = vpack.c.bf16 %v686_v57, %v683_v54  ;;  %1397 = vmatpush3.bf16.msra.mxu1 %v694_v43 }
 0x334   :  { %v695_v5 = vpack.c.bf16 %v678_v53, %v675_v52 }
 0x336   :  { %1398 = vmatprep.subr.bf16.mxu1 %v695_v5 }
 0x337   :  { %1399 = vmatpush3.bf16.msra.mxu1 %v695_v5 }
 0x338   :  { %1400 = vmatprep.subr.bf16.mxu1 %v696_v2 }
 0x33b   :  { %1401 = vmatpush3.bf16.msra.mxu1 %v696_v2 }
 0x33e   :  { %1403 = vmatmul.mubr.bf16.vlgmr.msra.gmra.mrb[16].mxu1 %v1865_v59 }
 0x33f   :  { %1406 = vmatprep.mubr.bf16.mxu1 %v1867_v60 }
 0x346   :  { %1407 = vmatmul.mubr.bf16.gmra.mrb[20].mxu1 %v1871_v61 }
 0x347   :  { %1410 = vmatprep.mubr.bf16.mxu1 %v1873_v62 }
 0x34e   :  { %1411 = vmatmul.mubr.bf16.gmra.mrb[24].mxu1 %v1877_v63 }
 0x34f   :  { %1414 = vmatprep.mubr.bf16.mxu1 %v1879_v0 }
 0x356   :  { %1415 = vmatmul.mubr.bf16.gmra.mrb[28].mxu1 %v1883_v1 }
 0x357   :  { %1466 = vmatprep.mubr.bf16.mxu1 %v1810_v17 }
 0x411   :  { %v1404_v55 = vpop.f32.mrb[16].mxu1 }
 0x412   :  { %v731_v56 = vpop.f32.mrb[17].mxu1  ;;  %v740_v9 = vadd.f32 %v1404_v55, %v1888_v3 }
 0x413   :  { %v1405_v8 = vpop.f32.mrb[18].mxu1  ;;  %v732_v12 = vadd.f32 %v731_v56, %v1894_v6 }
 0x414   :  { %v743_v10 = vadd.f32 %v1405_v8, %v1891_v4  ;;  %v734_v11 = vpop.f32.mrb[19].mxu1 }
 0x415   :  { %v735_v13 = vadd.f32 %v734_v11, %v1897_v7 }
 0x416   :  { %v795_v14 = vpack.c.bf16 %v743_v10, %v740_v9 }
 0x417   :  { %v794_v15 = vpack.c.bf16 %v735_v13, %v732_v12 }
 0x419   :  { %v1408_v16 = vpop.f32.mrb[20].mxu1  ;;  %1418 = vmatprep.subr.bf16.mxu0 %v794_v15 }
 0x41a   :  { %v747_v20 = vpop.f32.mrb[21].mxu1  ;;  %1419 = vmatpush3.bf16.msra.mxu0 %v794_v15  ;;  %v756_v24 = vadd.f32 %v1408_v16, %v1904_v18 }
 0x41b   :  { %v1409_v23 = vpop.f32.mrb[22].mxu1  ;;  %1420 = vmatprep.subr.bf16.mxu0 %v795_v14  ;;  %v748_v27 = vadd.f32 %v747_v20, %v1910_v21 }
 0x41c   :  { %v759_v25 = vadd.f32 %v1409_v23, %v1907_v19  ;;  %v750_v26 = vpop.f32.mrb[23].mxu1 }
 0x41d   :  { %v751_v28 = vadd.f32 %v750_v26, %v1913_v22 }
 0x41e   :  { %v797_v29 = vpack.c.bf16 %v759_v25, %v756_v24  ;;  %1421 = vmatpush3.bf16.msra.mxu0 %v795_v14 }
 0x41f   :  { %v796_v30 = vpack.c.bf16 %v751_v28, %v748_v27 }
 0x421   :  { %v1412_v31 = vpop.f32.mrb[24].mxu1  ;;  %1422 = vmatprep.subr.bf16.mxu0 %v796_v30 }
 0x422   :  { %v763_v34 = vpop.f32.mrb[25].mxu1  ;;  %1423 = vmatpush3.bf16.msra.mxu0 %v796_v30  ;;  %v772_v38 = vadd.f32 %v1412_v31, %v1920_v32 }
 0x423   :  { %v1413_v37 = vpop.f32.mrb[26].mxu1  ;;  %1424 = vmatprep.subr.bf16.mxu0 %v797_v29  ;;  %v764_v41 = vadd.f32 %v763_v34, %v1926_v35 }
 0x424   :  { %v775_v39 = vadd.f32 %v1413_v37, %v1923_v33  ;;  %v766_v40 = vpop.f32.mrb[27].mxu1 }
 0x425   :  { %v767_v42 = vadd.f32 %v766_v40, %v1929_v36 }
 0x426   :  { %v799_v43 = vpack.c.bf16 %v775_v39, %v772_v38  ;;  %1425 = vmatpush3.bf16.msra.mxu0 %v797_v29 }
 0x427   :  { %v798_v44 = vpack.c.bf16 %v767_v42, %v764_v41 }
 0x429   :  { %v1416_v47 = vpop.f32.mrb[28].mxu1  ;;  %1426 = vmatprep.subr.bf16.mxu0 %v798_v44 }
 0x42a   :  { %v779_v48 = vpop.f32.mrb[29].mxu1  ;;  %1427 = vmatpush3.bf16.msra.mxu0 %v798_v44  ;;  %v788_v54 = vadd.f32 %v1416_v47, %v1936_v45 }
 0x42b   :  { %v1417_v51 = vpop.f32.mrb[30].mxu1  ;;  %1428 = vmatprep.subr.bf16.mxu0 %v799_v43  ;;  %v780_v52 = vadd.f32 %v779_v48, %v1942_v49 }
 0x42c   :  { %v791_v57 = vadd.f32 %v1417_v51, %v1939_v46  ;;  %v782_v58 = vpop.f32.mrb[31].mxu1 }
 0x42d   :  { %v783_v53 = vadd.f32 %v782_v58, %v1945_v50 }
 0x42e   :  { %v801_v2 = vpack.c.bf16 %v791_v57, %v788_v54  ;;  %1429 = vmatpush3.bf16.msra.mxu0 %v799_v43 }
 0x42f   :  { %v800_v5 = vpack.c.bf16 %v783_v53, %v780_v52 }
 0x431   :  { %1430 = vmatprep.subr.bf16.mxu0 %v800_v5 }
 0x432   :  { %1431 = vmatpush3.bf16.msra.mxu0 %v800_v5 }
 0x433   :  { %1432 = vmatprep.subr.bf16.mxu0 %v801_v2 }
 0x436   :  { %1433 = vmatpush3.bf16.msra.mxu0 %v801_v2 }
 0x439   :  { %1435 = vmatmul.mubr.bf16.vlgmr.msra.gmra.mrb[32].mxu0 %v1865_v59 }
 0x43a   :  { %1438 = vmatprep.mubr.bf16.mxu0 %v1867_v60 }
 0x441   :  { %1439 = vmatmul.mubr.bf16.gmra.mrb[36].mxu0 %v1871_v61 }
 0x442   :  { %1442 = vmatprep.mubr.bf16.mxu0 %v1873_v62 }
 0x449   :  { %1443 = vmatmul.mubr.bf16.gmra.mrb[40].mxu0 %v1877_v63 }
 0x44a   :  { %1446 = vmatprep.mubr.bf16.mxu0 %v1879_v0 }
 0x451   :  { %1447 = vmatmul.mubr.bf16.gmra.mrb[44].mxu0 %v1883_v1 }
 0x452   :  { %1498 = vmatprep.mubr.bf16.mxu0 %v1810_v17 }
 0x50c   :  { %v1436_v55 = vpop.f32.mrb[32].mxu0 }
 0x50d   :  { %v836_v56 = vpop.f32.mrb[33].mxu0  ;;  %v845_v9 = vadd.f32 %v1436_v55, %v1888_v3 }
 0x50e   :  { %v1437_v8 = vpop.f32.mrb[34].mxu0  ;;  %v837_v12 = vadd.f32 %v836_v56, %v1894_v6 }
 0x50f   :  { %v848_v10 = vadd.f32 %v1437_v8, %v1891_v4  ;;  %v839_v11 = vpop.f32.mrb[35].mxu0 }
 0x510   :  { %v840_v13 = vadd.f32 %v839_v11, %v1897_v7 }
 0x511   :  { %v900_v14 = vpack.c.bf16 %v848_v10, %v845_v9 }
 0x512   :  { %v899_v15 = vpack.c.bf16 %v840_v13, %v837_v12 }
 0x514   :  { %v1440_v16 = vpop.f32.mrb[36].mxu0  ;;  %1450 = vmatprep.subr.bf16.mxu1 %v899_v15 }
 0x515   :  { %v852_v20 = vpop.f32.mrb[37].mxu0  ;;  %1451 = vmatpush3.bf16.msra.mxu1 %v899_v15  ;;  %v861_v17 = vadd.f32 %v1440_v16, %v1904_v18 }
 0x516   :  { %v1441_v23 = vpop.f32.mrb[38].mxu0  ;;  %1452 = vmatprep.subr.bf16.mxu1 %v900_v14  ;;  %v853_v26 = vadd.f32 %v852_v20, %v1910_v21 }
 0x517   :  { %v864_v24 = vadd.f32 %v1441_v23, %v1907_v19  ;;  %v855_v25 = vpop.f32.mrb[39].mxu0 }
 0x518   :  { %v856_v27 = vadd.f32 %v855_v25, %v1913_v22 }
 0x519   :  { %v902_v28 = vpack.c.bf16 %v864_v24, %v861_v17  ;;  %1453 = vmatpush3.bf16.msra.mxu1 %v900_v14 }
 0x51a   :  { %v901_v29 = vpack.c.bf16 %v856_v27, %v853_v26 }
 0x51c   :  { %v1444_v30 = vpop.f32.mrb[40].mxu0  ;;  %1454 = vmatprep.subr.bf16.mxu1 %v901_v29 }
 0x51d   :  { %v868_v31 = vpop.f32.mrb[41].mxu0  ;;  %1455 = vmatpush3.bf16.msra.mxu1 %v901_v29  ;;  %v877_v37 = vadd.f32 %v1444_v30, %v1920_v32 }
 0x51e   :  { %v1445_v34 = vpop.f32.mrb[42].mxu0  ;;  %1456 = vmatprep.subr.bf16.mxu1 %v902_v28  ;;  %v869_v40 = vadd.f32 %v868_v31, %v1926_v35 }
 0x51f   :  { %v880_v38 = vadd.f32 %v1445_v34, %v1923_v33  ;;  %v871_v39 = vpop.f32.mrb[43].mxu0 }
 0x520   :  { %v872_v41 = vadd.f32 %v871_v39, %v1929_v36 }
 0x521   :  { %v904_v42 = vpack.c.bf16 %v880_v38, %v877_v37  ;;  %1457 = vmatpush3.bf16.msra.mxu1 %v902_v28 }
 0x522   :  { %v903_v43 = vpack.c.bf16 %v872_v41, %v869_v40 }
 0x524   :  { %v1448_v44 = vpop.f32.mrb[44].mxu0  ;;  %1458 = vmatprep.subr.bf16.mxu1 %v903_v43 }
 0x525   :  { %v884_v47 = vpop.f32.mrb[45].mxu0  ;;  %1459 = vmatpush3.bf16.msra.mxu1 %v903_v43  ;;  %v893_v51 = vadd.f32 %v1448_v44, %v1936_v45 }
 0x526   :  { %v1449_v48 = vpop.f32.mrb[46].mxu0  ;;  %1460 = vmatprep.subr.bf16.mxu1 %v904_v42  ;;  %v885_v58 = vadd.f32 %v884_v47, %v1942_v49 }
 0x527   :  { %v896_v54 = vadd.f32 %v1449_v48, %v1939_v46  ;;  %v887_v57 = vpop.f32.mrb[47].mxu0 }
 0x528   :  { %v888_v52 = vadd.f32 %v887_v57, %v1945_v50 }
 0x529   :  { %v906_v53 = vpack.c.bf16 %v896_v54, %v893_v51  ;;  %1461 = vmatpush3.bf16.msra.mxu1 %v904_v42 }
 0x52a   :  { %v905_v2 = vpack.c.bf16 %v888_v52, %v885_v58 }
 0x52c   :  { %1462 = vmatprep.subr.bf16.mxu1 %v905_v2 }
 0x52d   :  { %1463 = vmatpush3.bf16.msra.mxu1 %v905_v2 }
 0x52e   :  { %1464 = vmatprep.subr.bf16.mxu1 %v906_v53 }
 0x531   :  { %1465 = vmatpush3.bf16.msra.mxu1 %v906_v53 }
 0x534   :  { %1467 = vmatmul.mubr.bf16.vlgmr.msra.gmra.mrb[32].mxu1 %v1865_v59 }
 0x535   :  { %1470 = vmatprep.mubr.bf16.mxu1 %v1867_v60 }
 0x53c   :  { %1471 = vmatmul.mubr.bf16.gmra.mrb[36].mxu1 %v1871_v61 }
 0x53d   :  { %1474 = vmatprep.mubr.bf16.mxu1 %v1873_v62 }
 0x544   :  { %1475 = vmatmul.mubr.bf16.gmra.mrb[40].mxu1 %v1877_v63 }
 0x545   :  { %1478 = vmatprep.mubr.bf16.mxu1 %v1879_v0 }
 0x54c   :  { %1479 = vmatmul.mubr.bf16.gmra.mrb[44].mxu1 %v1883_v1 }
 0x54d   :  { %1506 = vmatprep.mubr.bf16.mxu1 %v1873_v62 }
 0x607   :  { %v1468_v5 = vpop.f32.mrb[32].mxu1 }
 0x608   :  { %v941_v55 = vpop.f32.mrb[33].mxu1  ;;  %v950_v8 = vadd.f32 %v1468_v5, %v1888_v3 }
 0x609   :  { %v1469_v56 = vpop.f32.mrb[34].mxu1  ;;  %v942_v11 = vadd.f32 %v941_v55, %v1894_v6 }
 0x60a   :  { %v953_v9 = vadd.f32 %v1469_v56, %v1891_v4  ;;  %v944_v10 = vpop.f32.mrb[35].mxu1 }
 0x60b   :  { %v945_v12 = vadd.f32 %v944_v10, %v1897_v7 }
 0x60c   :  { %v1005_v13 = vpack.c.bf16 %v953_v9, %v950_v8 }
 0x60d   :  { %v1004_v14 = vpack.c.bf16 %v945_v12, %v942_v11 }
 0x60f   :  { %v1472_v15 = vpop.f32.mrb[36].mxu1  ;;  %1482 = vmatprep.subr.bf16.mxu0 %v1004_v14  ;;  %1514 = vmatprep.subr.bf16.mxu1 %v1004_v14 }
 0x610   :  { %v957_v16 = vpop.f32.mrb[37].mxu1  ;;  %1483 = vmatpush3.bf16.msra.mxu0 %v1004_v14  ;;  %1522 = vmatpush3.bf16.msra.mxu1 %v1004_v14  ;;  %v966_v20 = vadd.f32 %v1472_v15, %v1904_v18 }
 0x611   :  { %v1473_v62 = vpop.f32.mrb[38].mxu1  ;;  %1484 = vmatprep.subr.bf16.mxu0 %v1005_v13  ;;  %1515 = vmatprep.subr.bf16.mxu1 %v1005_v13  ;;  %v958_v24 = vadd.f32 %v957_v16, %v1910_v21 }
 0x612   :  { %v969_v23 = vadd.f32 %v1473_v62, %v1907_v19  ;;  %v960_v17 = vpop.f32.mrb[39].mxu1 }
 0x613   :  { %v961_v25 = vadd.f32 %v960_v17, %v1913_v22 }
 0x614   :  { %v1007_v26 = vpack.c.bf16 %v969_v23, %v966_v20  ;;  %1485 = vmatpush3.bf16.msra.mxu0 %v1005_v13  ;;  %1523 = vmatpush3.bf16.msra.mxu1 %v1005_v13 }
 0x615   :  { %v1006_v27 = vpack.c.bf16 %v961_v25, %v958_v24 }
 0x617   :  { %v1476_v28 = vpop.f32.mrb[40].mxu1  ;;  %1486 = vmatprep.subr.bf16.mxu0 %v1006_v27  ;;  %1516 = vmatprep.subr.bf16.mxu1 %v1006_v27 }
 0x618   :  { %v973_v29 = vpop.f32.mrb[41].mxu1  ;;  %1487 = vmatpush3.bf16.msra.mxu0 %v1006_v27  ;;  %1524 = vmatpush3.bf16.msra.mxu1 %v1006_v27  ;;  %v982_v31 = vadd.f32 %v1476_v28, %v1920_v32 }
 0x619   :  { %v1477_v30 = vpop.f32.mrb[42].mxu1  ;;  %1488 = vmatprep.subr.bf16.mxu0 %v1007_v26  ;;  %1517 = vmatprep.subr.bf16.mxu1 %v1007_v26  ;;  %v974_v38 = vadd.f32 %v973_v29, %v1926_v35 }
 0x61a   :  { %v985_v34 = vadd.f32 %v1477_v30, %v1923_v33  ;;  %v976_v37 = vpop.f32.mrb[43].mxu1 }
 0x61b   :  { %v977_v39 = vadd.f32 %v976_v37, %v1929_v36 }
 0x61c   :  { %v1009_v40 = vpack.c.bf16 %v985_v34, %v982_v31  ;;  %1489 = vmatpush3.bf16.msra.mxu0 %v1007_v26  ;;  %1525 = vmatpush3.bf16.msra.mxu1 %v1007_v26 }
 0x61d   :  { %v1008_v41 = vpack.c.bf16 %v977_v39, %v974_v38 }
 0x61f   :  { %v1480_v42 = vpop.f32.mrb[44].mxu1  ;;  %1490 = vmatprep.subr.bf16.mxu0 %v1008_v41  ;;  %1518 = vmatprep.subr.bf16.mxu1 %v1008_v41 }
 0x620   :  { %v989_v43 = vpop.f32.mrb[45].mxu1  ;;  %1491 = vmatpush3.bf16.msra.mxu0 %v1008_v41  ;;  %1526 = vmatpush3.bf16.msra.mxu1 %v1008_v41  ;;  %v998_v47 = vadd.f32 %v1480_v42, %v1936_v45 }
 0x621   :  { %v1481_v44 = vpop.f32.mrb[46].mxu1  ;;  %1492 = vmatprep.subr.bf16.mxu0 %v1009_v40  ;;  %1519 = vmatprep.subr.bf16.mxu1 %v1009_v40  ;;  %v990_v54 = vadd.f32 %v989_v43, %v1942_v49 }
 0x622   :  { %v1001_v48 = vadd.f32 %v1481_v44, %v1939_v46  ;;  %v992_v51 = vpop.f32.mrb[47].mxu1 }
 0x623   :  { %v993_v57 = vadd.f32 %v992_v51, %v1945_v50 }
 0x624   :  { %v1011_v58 = vpack.c.bf16 %v1001_v48, %v998_v47  ;;  %1493 = vmatpush3.bf16.msra.mxu0 %v1009_v40  ;;  %1527 = vmatpush3.bf16.msra.mxu1 %v1009_v40 }
 0x625   :  { %v1010_v52 = vpack.c.bf16 %v993_v57, %v990_v54 }
 0x627   :  { %1494 = vmatprep.subr.bf16.mxu0 %v1010_v52  ;;  %1520 = vmatprep.subr.bf16.mxu1 %v1010_v52 }
 0x628   :  { %1495 = vmatpush3.bf16.msra.mxu0 %v1010_v52  ;;  %1528 = vmatpush3.bf16.msra.mxu1 %v1010_v52 }
 0x629   :  { %1496 = vmatprep.subr.bf16.mxu0 %v1011_v58  ;;  %1521 = vmatprep.subr.bf16.mxu1 %v1011_v58 }
 0x62c   :  { %1497 = vmatpush3.bf16.msra.mxu0 %v1011_v58  ;;  %1529 = vmatpush3.bf16.msra.mxu1 %v1011_v58 }
 0x62f   :  { %1499 = vmatmul.mubr.bf16.vlgmr.msra.gmra.mrb[48].mxu0 %v1865_v59  ;;  %1507 = vmatmul.mubr.bf16.vlgmr.msra.gmra.mrb[48].mxu1 %v1877_v63 }
 0x630   :  { %1502 = vmatprep.mubr.bf16.mxu0 %v1867_v60  ;;  %1510 = vmatprep.mubr.bf16.mxu1 %v1879_v0 }
 0x637   :  { %1503 = vmatmul.mubr.bf16.gmra.mrb[52].mxu0 %v1871_v61  ;;  %1511 = vmatmul.mubr.bf16.gmra.mrb[52].mxu1 %v1883_v1 }
 0x702   :  { %v1500_v53 = vpop.f32.mrb[48].mxu0  ;;  %v1508_v2 = vpop.f32.mrb[48].mxu1 }
 0x703   :  { %v1055_v5 = vadd.f32 %v1500_v53, %v1888_v3  ;;  %v1087_v55 = vadd.f32 %v1508_v2, %v1920_v32  ;;  %v1046_v56 = vpop.f32.mrb[49].mxu0  ;;  %v1078_v8 = vpop.f32.mrb[49].mxu1 }
 0x704   :  { %v1047_v59 = vadd.f32 %v1046_v56, %v1894_v6  ;;  %v1079_v63 = vadd.f32 %v1078_v8, %v1926_v35  ;;  %v1501_v9 = vpop.f32.mrb[50].mxu0  ;;  %v1509_v60 = vpop.f32.mrb[50].mxu1 }
 0x705   :  { %1111 = vst [vmem:[#allocation10 + $0x10] sm:$0xff] %v1055_v5  ;;  %1119 = vst [vmem:[#allocation10 + $0x50] sm:$0xff] %v1087_v55  ;;  %v1058_v61 = vadd.f32 %v1501_v9, %v1891_v4  ;;  %v1090_v0 = vadd.f32 %v1509_v60, %v1923_v33  ;;  %v1049_v1 = vpop.f32.mrb[51].mxu0  ;;  %v1081_v10 = vpop.f32.mrb[51].mxu1 }
 0x706   :  { %1109 = vst [vmem:[#allocation10] sm:$0xff] %v1047_v59  ;;  %1117 = vst [vmem:[#allocation10 + $0x40] sm:$0xff] %v1079_v63  ;;  %v1050_v3 = vadd.f32 %v1049_v1, %v1897_v7  ;;  %v1082_v32 = vadd.f32 %v1081_v10, %v1929_v36 }
 0x707   :  { %1112 = vst [vmem:[#allocation10 + $0x18] sm:$0xff] %v1058_v61  ;;  %1120 = vst [vmem:[#allocation10 + $0x58] sm:$0xff] %v1090_v0 }
 0x708   :  { %1110 = vst [vmem:[#allocation10 + $0x8] sm:$0xff] %v1050_v3  ;;  %1118 = vst [vmem:[#allocation10 + $0x48] sm:$0xff] %v1082_v32 }
 0x70a   :  { %v1504_v6 = vpop.f32.mrb[52].mxu0  ;;  %v1512_v35 = vpop.f32.mrb[52].mxu1 }
 0x70b   :  { %v1071_v4 = vadd.f32 %v1504_v6, %v1904_v18  ;;  %v1103_v33 = vadd.f32 %v1512_v35, %v1936_v45  ;;  %v1062_v11 = vpop.f32.mrb[53].mxu0  ;;  %v1094_v12 = vpop.f32.mrb[53].mxu1 }
 0x70c   :  { %v1063_v13 = vadd.f32 %v1062_v11, %v1910_v21  ;;  %v1095_v7 = vadd.f32 %v1094_v12, %v1942_v49  ;;  %v1505_v14 = vpop.f32.mrb[54].mxu0  ;;  %v1513_v36 = vpop.f32.mrb[54].mxu1 }
 0x70d   :  { %1115 = vst [vmem:[#allocation10 + $0x30] sm:$0xff] %v1071_v4  ;;  %1123 = vst [vmem:[#allocation10 + $0x70] sm:$0xff] %v1103_v33  ;;  %v1074_v15 = vadd.f32 %v1505_v14, %v1907_v19  ;;  %v1106_v16 = vadd.f32 %v1513_v36, %v1939_v46  ;;  %v1065_v62 = vpop.f32.mrb[55].mxu0  ;;  %v1097_v20 = vpop.f32.mrb[55].mxu1 }
 0x70e   :  { %1113 = vst [vmem:[#allocation10 + $0x20] sm:$0xff] %v1063_v13  ;;  %1121 = vst [vmem:[#allocation10 + $0x60] sm:$0xff] %v1095_v7  ;;  %v1066_v18 = vadd.f32 %v1065_v62, %v1913_v22  ;;  %v1098_v45 = vadd.f32 %v1097_v20, %v1945_v50 }
 0x70f   :  { %1116 = vst [vmem:[#allocation10 + $0x38] sm:$0xff] %v1074_v15  ;;  %1124 = vst [vmem:[#allocation10 + $0x78] sm:$0xff] %v1106_v16 }
 0x710   :  { %1114 = vst [vmem:[#allocation10 + $0x28] sm:$0xff] %v1066_v18  ;;  %1122 = vst [vmem:[#allocation10 + $0x68] sm:$0xff] %v1098_v45 }
 0x711   :  { %1670 = shalt.err (!%p1667_p8)
}
 0x712   :  { %s1671_s26 = scalar_lea.hbm %s2063_s6, 2048 }
 0x713   :  { %p1672_p9 = scmp.ne.s32.totalorder %s2063_s6, %s1671_s26  ;;  %p1675_p10 = scmp.lt.u32.totalorder %s1671_s26, %s2063_s6 }
 0x715   :  { %p1677_p11 = pnand %p1675_p10, %p1672_p9 }
 0x717   :  { %1680 = shalt.err (!%p1677_p11)
}
 0x718   :  { %s1696_s7 = smov 128   ;;  %s1697_s8 = smov 8  }
 0x719   :  { %1136 = dma.vmem_to_hbm [thread:$0]  %s1131_s21, 2048, %s2063_s6, [#allocation4], %s1696_s7, %s1696_s7, %s1697_s8  }
 0x71a   :  { %1687 = dma.done.wait [#allocation4], 2048  }
 0x71b   :  { %1688 = vsyncadd [#allocation4], 4294965248 }
 0x71c   :  { %1140 = vsyncpa [#allocation3], 1 }
 0x71d   :  { %1141 = vsyncpa [#allocation6], 1 }
 0x71e   :  { %1142 = vsyncpa [#allocation9], 1 }
 0x71f   :  { %1143 = vsyncpa [#allocation4], 1 }

</bundles_post_ra>
